<compile_context>
chip_gen: v5e
topology: v5e:2x2
jax: 0.10.0
libtpu: 0.0.40
codegen_flags: <defaults>
</compile_context>

<pallas_src>
import functools
import math

import jax
import jax.numpy as jnp
from jax import lax
from jax.experimental import pallas as pl
from jax.experimental.pallas import tpu as pltpu


def _round_up(x, m):
    return (x + m - 1) // m * m


def _relpos_kernel(kpat_ref, ttile_ref, out_ref, *, max_rel, tq, tk, nu):
    # kpat_ref : (1, tk*nu) int32, kpat[0, k*nu + u] = k        (grid-invariant)
    # ttile_ref: (vocab, tk*nu) f32, ttile[v, k*nu + u] = table[v, u]
    # out_ref  : (tq, tk*nu) f32 block of the lane-dense output slab
    i = pl.program_id(0)
    j = pl.program_id(1)
    vocab = ttile_ref.shape[0]
    w = tk * nu

    # Relative distance at the tile origin and its range over the whole tile.
    base = j * tk - i * tq                      # dist(q_local=0, k_local=0)
    d_min = base - (tq - 1)
    d_max = base + (tk - 1)

    # Fast path: tile entirely clamped to +max_rel (or -max_rel)
    # -> every output row of the block is the same pre-tiled table row.
    @pl.when(d_min >= max_rel)
    def _():
        row = ttile_ref[pl.ds(vocab - 1, 1), :]               # (1, w)
        out_ref[...] = jnp.broadcast_to(row, (tq, w))

    @pl.when(d_max <= -max_rel)
    def _():
        row = ttile_ref[pl.ds(0, 1), :]                       # (1, w)
        out_ref[...] = jnp.broadcast_to(row, (tq, w))

    # General path (diagonal-band tiles only): vocab-length select chain.
    # NOTE: cost is O(vocab) VPU selects per element; fine for the small
    # max_relative_position this module is used with.
    @pl.when(jnp.logical_and(d_min < max_rel, d_max > -max_rel))
    def _():
        q_iota = lax.broadcasted_iota(jnp.int32, (tq, w), 0)
        dist = (kpat_ref[...] + base) - q_iota                # (tq, w) int32
        acc = jnp.broadcast_to(ttile_ref[pl.ds(0, 1), :], (tq, w))  # dist<=-m
        for v in range(1, vocab - 1):
            acc = jnp.where(dist == (v - max_rel),
                            ttile_ref[pl.ds(v, 1), :], acc)
        if vocab > 1:
            acc = jnp.where(dist >= max_rel,
                            ttile_ref[pl.ds(vocab - 1, 1), :], acc)
        out_ref[...] = acc


def relative_position(embeddings_table, length_q, length_k,
                      max_relative_position, *, tile_q=256, tile_lanes=2048):
    """embeddings_table: (2*max_rel+1, num_units) float32.
    Returns (length_q, length_k, num_units) float32 (PyTorch forward)."""
    embeddings_table = jnp.asarray(embeddings_table, jnp.float32)
    vocab, nu = embeddings_table.shape
    assert vocab == 2 * max_relative_position + 1

    # --- tile sizes: lane-dense blocks, bounded VMEM on v5e/v6e/v7x ---
    # Rows (sublane dim): multiple of 8.
    tq = min(_round_up(length_q, 8), _round_up(tile_q, 8))
    lq_pad = _round_up(length_q, tq)
    # Columns: block last dim tk*nu must be a multiple of 128 lanes.
    k_align = 128 // math.gcd(nu, 128)
    tk = min(_round_up(length_k, k_align),
             max(k_align, _round_up(max(tile_lanes // nu, 1), k_align)))
    lk_pad = _round_up(length_k, tk)
    w = tk * nu

    # Pre-tiled table: ttile[v, k*nu + u] = table[v, u]  (tiny, VMEM-resident).
    table_tiled = jnp.tile(embeddings_table, (1, tk))                   # (vocab, w)
    # k index of every output lane within a tile: kpat[0, k*nu + u] = k.
    k_pattern = jnp.repeat(jnp.arange(tk, dtype=jnp.int32), nu)[None]   # (1, w)

    grid = (lq_pad // tq, lk_pad // tk)
    kernel = functools.partial(_relpos_kernel, max_rel=max_relative_position,
                               tq=tq, tk=tk, nu=nu)

    out_bytes = lq_pad * lk_pad * nu * 4
    out2d = pl.pallas_call(
        kernel,
        out_shape=jax.ShapeDtypeStruct((lq_pad, lk_pad * nu), jnp.float32),
        grid_spec=pltpu.PrefetchScalarGridSpec(
            num_scalar_prefetch=0,
            grid=grid,
            in_specs=[
                pl.BlockSpec((1, w), lambda i, j: (0, 0)),       # k_pattern
                pl.BlockSpec((vocab, w), lambda i, j: (0, 0)),   # tiled table
            ],
            out_specs=pl.BlockSpec((tq, w), lambda i, j: (i, j)),
        ),
        compiler_params=pltpu.CompilerParams(
            dimension_semantics=("parallel", "parallel")),
        cost_estimate=pl.CostEstimate(
            flops=2 * lq_pad * lk_pad * nu,          # compare/select filler
            transcendentals=0,
            bytes_accessed=out_bytes + vocab * w * 4 + w * 4),
    )(k_pattern, table_tiled)

    # Contiguous (free) reshape in the wrapper; skip the un-pad slice (an
    # extra HBM copy) when the lengths already tile evenly.
    out3d = out2d.reshape(lq_pad, lk_pad, nu)
    if lq_pad == length_q and lk_pad == length_k:
        return out3d
    return out3d[:length_q, :length_k, :]


def _xavier_uniform(key, shape, dtype=jnp.float32):
    fan_out, fan_in = shape
    bound = (6.0 / (fan_in + fan_out)) ** 0.5
    return jax.random.uniform(key, shape, dtype, minval=-bound, maxval=bound)


def _reference(table, lq, lk, max_rel):
    rq = jnp.arange(lq)
    rk = jnp.arange(lk)
    dist = rk[None, :] - rq[:, None]
    idx = jnp.clip(dist, -max_rel, max_rel) + max_rel
    return table[idx]


if __name__ == "__main__":
    key = jax.random.PRNGKey(0)

    # Case 1: small square (matches the module's toy usage).
    num_units = 32
    max_rel = 4
    k1, k2 = jax.random.split(key)
    table = _xavier_uniform(k1, (2 * max_rel + 1, num_units))
    lq, lk = 8, 8
    out = jax.block_until_ready(relative_position(table, lq, lk, max_rel))
    ref = _reference(table, lq, lk, max_rel)
    assert out.shape == (lq, lk, num_units)
    assert jnp.allclose(out, ref, atol=1e-6)

    # Case 2: non-multiple lengths -> exercises padding, the multi-tile grid
    # and the fully-clamped fast path.
    lq2, lk2 = 48, 100
    out2 = jax.block_until_ready(relative_position(table, lq2, lk2, max_rel))
    ref2 = _reference(table, lq2, lk2, max_rel)
    assert out2.shape == (lq2, lk2, num_units)
    assert jnp.allclose(out2, ref2, atol=1e-6)

    # Case 3: num_units not a power of two (exercises lane alignment logic)
    # and a different max_relative_position.
    num_units3, max_rel3 = 48, 3
    table3 = _xavier_uniform(k2, (2 * max_rel3 + 1, num_units3))
    lq3, lk3 = 40, 72
    out3 = jax.block_until_ready(relative_position(table3, lq3, lk3, max_rel3))
    ref3 = _reference(table3, lq3, lk3, max_rel3)
    assert out3.shape == (lq3, lk3, num_units3)
    assert jnp.allclose(out3, ref3, atol=1e-6)

    print("KERNEL_OK")
</pallas_src>

<mosaic_0001>
module attributes {stable_mosaic.version = 11 : i64} {
  func.func @_relpos_kernel(%arg0: i32, %arg1: i32, %arg2: memref<1x256xi32, #tpu.memory_space<vmem>>, %arg3: memref<9x256xf32, #tpu.memory_space<vmem>>, %arg4: memref<8x256xf32, #tpu.memory_space<vmem>>) attributes {dimension_semantics = [#tpu.dimension_semantics<parallel>, #tpu.dimension_semantics<parallel>], iteration_bounds = array<i64: 1, 1>, scalar_prefetch = 0 : i64, scratch_operands = 0 : i64, tpu.core_type = #tpu.core_type<tc>, window_params = [{pipeline_mode = #tpu.pipeline_mode<synchronous>, transform_indices = @transform_0, window_bounds = array<i64: 1, 256>}, {pipeline_mode = #tpu.pipeline_mode<synchronous>, transform_indices = @transform_1, window_bounds = array<i64: 9, 256>}, {transform_indices = @transform_2, window_bounds = array<i64: 8, 256>}]} {
    %c8_i32 = arith.constant 8 : i32
    %0 = arith.muli %arg1, %c8_i32 : i32
    %c8_i32_0 = arith.constant 8 : i32
    %1 = arith.muli %arg0, %c8_i32_0 : i32
    %2 = arith.subi %0, %1 : i32
    %c7_i32 = arith.constant 7 : i32
    %3 = arith.subi %2, %c7_i32 : i32
    %c7_i32_1 = arith.constant 7 : i32
    %4 = arith.addi %2, %c7_i32_1 : i32
    %c4_i32 = arith.constant 4 : i32
    %5 = arith.cmpi sge, %3, %c4_i32 : i32
    %6 = arith.extui %5 : i1 to i32
    %c0_i32 = arith.constant 0 : i32
    %7 = arith.cmpi ne, %6, %c0_i32 : i32
    scf.if %7 {
      %c8 = arith.constant 8 : index
      %c0 = arith.constant 0 : index
      %16 = vector.load %arg3[%c8, %c0] : memref<9x256xf32, #tpu.memory_space<vmem>>, vector<1x256xf32>
      %17 = vector.shape_cast %16 : vector<1x256xf32> to vector<1x256xf32>
      %18 = vector.broadcast %17 : vector<1x256xf32> to vector<8x256xf32>
      %c0_6 = arith.constant 0 : index
      %c0_7 = arith.constant 0 : index
      %19 = vector.load %arg4[%c0_6, %c0_7] : memref<8x256xf32, #tpu.memory_space<vmem>>, vector<8x256xf32>
      tpu.vector_store %arg4[%c0_6, %c0_7], %18 {strides = array<i32>} : memref<8x256xf32, #tpu.memory_space<vmem>>, vector<8x256xf32>,
    } else {
    }
    %c-4_i32 = arith.constant -4 : i32
    %8 = arith.cmpi sle, %4, %c-4_i32 : i32
    %9 = arith.extui %8 : i1 to i32
    %c0_i32_2 = arith.constant 0 : i32
    %10 = arith.cmpi ne, %9, %c0_i32_2 : i32
    scf.if %10 {
      %c0 = arith.constant 0 : index
      %c0_6 = arith.constant 0 : index
      %16 = vector.load %arg3[%c0, %c0_6] : memref<9x256xf32, #tpu.memory_space<vmem>>, vector<1x256xf32>
      %17 = vector.shape_cast %16 : vector<1x256xf32> to vector<1x256xf32>
      %18 = vector.broadcast %17 : vector<1x256xf32> to vector<8x256xf32>
      %c0_7 = arith.constant 0 : index
      %c0_8 = arith.constant 0 : index
      %19 = vector.load %arg4[%c0_7, %c0_8] : memref<8x256xf32, #tpu.memory_space<vmem>>, vector<8x256xf32>
      tpu.vector_store %arg4[%c0_7, %c0_8], %18 {strides = array<i32>} : memref<8x256xf32, #tpu.memory_space<vmem>>, vector<8x256xf32>,
    } else {
    }
    %c4_i32_3 = arith.constant 4 : i32
    %11 = arith.cmpi slt, %3, %c4_i32_3 : i32
    %c-4_i32_4 = arith.constant -4 : i32
    %12 = arith.cmpi sgt, %4, %c-4_i32_4 : i32
    %13 = arith.andi %11, %12 : i1
    %14 = arith.extui %13 : i1 to i32
    %c0_i32_5 = arith.constant 0 : i32
    %15 = arith.cmpi ne, %14, %c0_i32_5 : i32
    scf.if %15 {
      %16 = tpu.iota {dimensions = array<i32: 0>} : vector<8x256xi32>
      %c0 = arith.constant 0 : index
      %c0_6 = arith.constant 0 : index
      %17 = vector.load %arg2[%c0, %c0_6] : memref<1x256xi32, #tpu.memory_space<vmem>>, vector<1x256xi32>
      %18 = vector.broadcast %2 : i32 to vector<1x256xi32>
      %19 = arith.addi %17, %18 : vector<1x256xi32>
      %20 = vector.broadcast %19 : vector<1x256xi32> to vector<8x256xi32>
      %21 = arith.subi %20, %16 : vector<8x256xi32>
      %c0_7 = arith.constant 0 : index
      %c0_8 = arith.constant 0 : index
      %22 = vector.load %arg3[%c0_7, %c0_8] : memref<9x256xf32, #tpu.memory_space<vmem>>, vector<1x256xf32>
      %23 = vector.shape_cast %22 : vector<1x256xf32> to vector<1x256xf32>
      %24 = vector.broadcast %23 : vector<1x256xf32> to vector<8x256xf32>
      %c-3_i32 = arith.constant -3 : i32
      %25 = vector.broadcast %c-3_i32 : i32 to vector<8x256xi32>
      %26 = arith.cmpi eq, %21, %25 : vector<8x256xi32>
      %c1 = arith.constant 1 : index
      %c0_9 = arith.constant 0 : index
      %27 = vector.load %arg3[%c1, %c0_9] : memref<9x256xf32, #tpu.memory_space<vmem>>, vector<1x256xf32>
      %28 = vector.shape_cast %27 : vector<1x256xf32> to vector<1x256xf32>
      %29 = vector.broadcast %28 : vector<1x256xf32> to vector<8x256xf32>
      %30 = arith.select %26, %29, %24 : vector<8x256xi1>, vector<8x256xf32>
      %c-2_i32 = arith.constant -2 : i32
      %31 = vector.broadcast %c-2_i32 : i32 to vector<8x256xi32>
      %32 = arith.cmpi eq, %21, %31 : vector<8x256xi32>
      %c2 = arith.constant 2 : index
      %c0_10 = arith.constant 0 : index
      %33 = vector.load %arg3[%c2, %c0_10] : memref<9x256xf32, #tpu.memory_space<vmem>>, vector<1x256xf32>
      %34 = vector.shape_cast %33 : vector<1x256xf32> to vector<1x256xf32>
      %35 = vector.broadcast %34 : vector<1x256xf32> to vector<8x256xf32>
      %36 = arith.select %32, %35, %30 : vector<8x256xi1>, vector<8x256xf32>
      %c-1_i32 = arith.constant -1 : i32
      %37 = vector.broadcast %c-1_i32 : i32 to vector<8x256xi32>
      %38 = arith.cmpi eq, %21, %37 : vector<8x256xi32>
      %c3 = arith.constant 3 : index
      %c0_11 = arith.constant 0 : index
      %39 = vector.load %arg3[%c3, %c0_11] : memref<9x256xf32, #tpu.memory_space<vmem>>, vector<1x256xf32>
      %40 = vector.shape_cast %39 : vector<1x256xf32> to vector<1x256xf32>
      %41 = vector.broadcast %40 : vector<1x256xf32> to vector<8x256xf32>
      %42 = arith.select %38, %41, %36 : vector<8x256xi1>, vector<8x256xf32>
      %c0_i32_12 = arith.constant 0 : i32
      %43 = vector.broadcast %c0_i32_12 : i32 to vector<8x256xi32>
      %44 = arith.cmpi eq, %21, %43 : vector<8x256xi32>
      %c4 = arith.constant 4 : index
      %c0_13 = arith.constant 0 : index
      %45 = vector.load %arg3[%c4, %c0_13] : memref<9x256xf32, #tpu.memory_space<vmem>>, vector<1x256xf32>
      %46 = vector.shape_cast %45 : vector<1x256xf32> to vector<1x256xf32>
      %47 = vector.broadcast %46 : vector<1x256xf32> to vector<8x256xf32>
      %48 = arith.select %44, %47, %42 : vector<8x256xi1>, vector<8x256xf32>
      %c1_i32 = arith.constant 1 : i32
      %49 = vector.broadcast %c1_i32 : i32 to vector<8x256xi32>
      %50 = arith.cmpi eq, %21, %49 : vector<8x256xi32>
      %c5 = arith.constant 5 : index
      %c0_14 = arith.constant 0 : index
      %51 = vector.load %arg3[%c5, %c0_14] : memref<9x256xf32, #tpu.memory_space<vmem>>, vector<1x256xf32>
      %52 = vector.shape_cast %51 : vector<1x256xf32> to vector<1x256xf32>
      %53 = vector.broadcast %52 : vector<1x256xf32> to vector<8x256xf32>
      %54 = arith.select %50, %53, %48 : vector<8x256xi1>, vector<8x256xf32>
      %c2_i32 = arith.constant 2 : i32
      %55 = vector.broadcast %c2_i32 : i32 to vector<8x256xi32>
      %56 = arith.cmpi eq, %21, %55 : vector<8x256xi32>
      %c6 = arith.constant 6 : index
      %c0_15 = arith.constant 0 : index
      %57 = vector.load %arg3[%c6, %c0_15] : memref<9x256xf32, #tpu.memory_space<vmem>>, vector<1x256xf32>
      %58 = vector.shape_cast %57 : vector<1x256xf32> to vector<1x256xf32>
      %59 = vector.broadcast %58 : vector<1x256xf32> to vector<8x256xf32>
      %60 = arith.select %56, %59, %54 : vector<8x256xi1>, vector<8x256xf32>
      %c3_i32 = arith.constant 3 : i32
      %61 = vector.broadcast %c3_i32 : i32 to vector<8x256xi32>
      %62 = arith.cmpi eq, %21, %61 : vector<8x256xi32>
      %c7 = arith.constant 7 : index
      %c0_16 = arith.constant 0 : index
      %63 = vector.load %arg3[%c7, %c0_16] : memref<9x256xf32, #tpu.memory_space<vmem>>, vector<1x256xf32>
      %64 = vector.shape_cast %63 : vector<1x256xf32> to vector<1x256xf32>
      %65 = vector.broadcast %64 : vector<1x256xf32> to vector<8x256xf32>
      %66 = arith.select %62, %65, %60 : vector<8x256xi1>, vector<8x256xf32>
      %c4_i32_17 = arith.constant 4 : i32
      %67 = vector.broadcast %c4_i32_17 : i32 to vector<8x256xi32>
      %68 = arith.cmpi sge, %21, %67 : vector<8x256xi32>
      %c8 = arith.constant 8 : index
      %c0_18 = arith.constant 0 : index
      %69 = vector.load %arg3[%c8, %c0_18] : memref<9x256xf32, #tpu.memory_space<vmem>>, vector<1x256xf32>
      %70 = vector.shape_cast %69 : vector<1x256xf32> to vector<1x256xf32>
      %71 = vector.broadcast %70 : vector<1x256xf32> to vector<8x256xf32>
      %72 = arith.select %68, %71, %66 : vector<8x256xi1>, vector<8x256xf32>
      %c0_19 = arith.constant 0 : index
      %c0_20 = arith.constant 0 : index
      %73 = vector.load %arg4[%c0_19, %c0_20] : memref<8x256xf32, #tpu.memory_space<vmem>>, vector<8x256xf32>
      tpu.vector_store %arg4[%c0_19, %c0_20], %72 {strides = array<i32>} : memref<8x256xf32, #tpu.memory_space<vmem>>, vector<8x256xf32>,
    } else {
    }
    return
  }
  func.func @transform_0(%arg0: i32, %arg1: i32) -> (i32, i32) {
    %c0_i32 = arith.constant 0 : i32
    %c0_i32_0 = arith.constant 0 : i32
    %c0_i32_1 = arith.constant 0 : i32
    return %c0_i32, %c0_i32_0 : i32, i32
  }
  func.func @transform_1(%arg0: i32, %arg1: i32) -> (i32, i32) {
    %c0_i32 = arith.constant 0 : i32
    %c0_i32_0 = arith.constant 0 : i32
    %c0_i32_1 = arith.constant 0 : i32
    return %c0_i32, %c0_i32_0 : i32, i32
  }
  func.func @transform_2(%arg0: i32, %arg1: i32) -> (i32, i32) {
    %c0_i32 = arith.constant 0 : i32
    return %arg0, %arg1 : i32, i32
  }
}

</mosaic_0001>

<bundles_post_ra>
// kernel: tpu_custom_call.1
= control target key start
LH: loop header
LB: loop body
LE: loop exit
PB: predicated region body
PF: predicated region fallthrough
CT: control target
= control target key end

     0   :  { %7 = vsyncpa [#allocation3], 0  ;;  %s318_s0 = inlined_call_operand.hbm [shape: s32[1,256], index: 0, kind: input, shape index: {}]   ;;  %s319_s1 = inlined_call_operand.hbm [shape: f32[9,256], index: 1, kind: input, shape index: {}]   ;;  %s320_s2 = inlined_call_operand.hbm [shape: f32[8,256], index: 2, kind: output, shape index: {}]  }
   0x1   :  { %8 = vsyncpa [#allocation6], 0 }
   0x2   :  { %9 = vsyncpa [#allocation4], 0  ;;  %s15_s11 = sshll.u32 %s318_s0, 4  ;;  %s284_s12 = smov [#allocation2]   ;;  %s16_s11 = int_to_ptr.hbm [resolvable:$true] %s15_s11 }
   0x3   :  { %s17_s13 = sshll.u32 %s284_s12, 4  ;;  %s25_s16 = sshll.u32 %s319_s1, 4  ;;  %s18_s13 = int_to_ptr.vmem [resolvable:$true] %s17_s13  ;;  %s26_s16 = int_to_ptr.hbm [resolvable:$true] %s25_s16 }
   0x4   :  { %20 = dma.hbm_to_vmem [thread:$0]  %s16_s11, 32, %s18_s13, [#allocation3]  }
   0x5   :  { %s285_s17 = smov [#allocation5]   ;;  %s286_s19 = smov 256  }
   0x6   :  { %s27_s18 = sshll.u32 %s285_s17, 4  ;;  %s287_s20 = smov 16   ;;  %s28_s18 = int_to_ptr.vmem [resolvable:$true] %s27_s18 }
   0x7   :  { %33 = dma.hbm_to_vmem [thread:$0]  %s26_s16, 512, %s28_s18, [#allocation6], %s286_s19, %s286_s19, %s287_s20  }
   0x8   :  { %278 = dma.done.wait [#allocation3], 32  }
   0x9   :  { %279 = vsyncadd [#allocation3], 4294967264 }
   0xa   :  { %280 = dma.done.wait [#allocation6], 512  }
   0xb   :  { %281 = vsyncadd [#allocation6], 4294966784  ;;  %v78_v0 = vlaneseq  ;;  %v80_v2 = vld [vmem:[#allocation2] sm:$0x3]  ;;  %s288_s0 = smov [#allocation7]   ;;  %s190_s23 = sshll.u32 %s320_s2, 4  ;;  %s191_s23 = int_to_ptr.hbm [resolvable:$true] %s190_s23 }
   0xc   :  { %v87_v3 = vld [vmem:[#allocation5] ss:$8 sm:$0x3]  ;;  %v83_v4 = vperm.slane %v80_v2, 0  ;;  %v84_v6 = vperm.slane %v80_v2, 1  ;;  %s188_s1 = sshll.u32 %s288_s0, 4  ;;  %s189_s1 = int_to_ptr.vmem [resolvable:$true] %s188_s1 }
   0xd   :  { %v79_v1 = vshrl.u32 %v78_v0, 7  ;;  %v96_v5 = vld [vmem:[#allocation5 + $0x1] ss:$8 sm:$0x3]  ;;  %v89_v7 = vperm.slane %v87_v3, 0  ;;  %v90_v13 = vperm.slane %v87_v3, 1 }
   0xe   :  { %v98_v8 = vperm.slane %v96_v5, 0  ;;  %v107_v9 = vld [vmem:[#allocation5 + $0x2] ss:$8 sm:$0x3]  ;;  %v99_v14 = vperm.slane %v96_v5, 1 }
   0xf   :  { %v85_v10 = vsub.s32 %v83_v4, %v79_v1  ;;  %v109_v11 = vperm.slane %v107_v9, 0  ;;  %v118_v12 = vld [vmem:[#allocation5 + $0x3] ss:$8 sm:$0x3]  ;;  %v86_v17 = vsub.s32 %v84_v6, %v79_v1  ;;  %v110_v18 = vperm.slane %v107_v9, 1 }
  0x10   :  { %v120_v15 = vperm.slane %v118_v12, 0  ;;  %v129_v16 = vld [vmem:[#allocation5 + $0x4] ss:$8 sm:$0x3]  ;;  %v121_v19 = vperm.slane %v118_v12, 1 }
  0x11   :  { %vm93_vm0 = vcmp.eq.s32.totalorder %v85_v10, 4294967293  ;;  %vm104_vm1 = vcmp.eq.s32.totalorder %v85_v10, 4294967294  ;;  %vm115_vm2 = vcmp.eq.s32.totalorder %v85_v10, 4294967295  ;;  %vm126_vm3 = vcmp.eq.s32.totalorder %v85_v10, 0 }
  0x12   :  { %v102_v20 = vsel %vm93_vm0, %v98_v8, %v89_v7  ;;  %v131_v21 = vperm.slane %v129_v16, 0  ;;  %vm137_vm4 = vcmp.eq.s32.totalorder %v85_v10, 1  ;;  %v140_v22 = vld [vmem:[#allocation5 + $0x5] ss:$8 sm:$0x3]  ;;  %vm148_vm5 = vcmp.eq.s32.totalorder %v85_v10, 2 }
  0x13   :  { %v113_v23 = vsel %vm104_vm1, %v109_v11, %v102_v20  ;;  %v142_v24 = vperm.slane %v140_v22, 0  ;;  %v151_v25 = vld [vmem:[#allocation5 + $0x6] ss:$8 sm:$0x3]  ;;  %vm159_vm6 = vcmp.eq.s32.totalorder %v85_v10, 3  ;;  %vm170_vm7 = vcmp.ge.s32.totalorder %v85_v10, 4 }
  0x14   :  { %v124_v26 = vsel %vm115_vm2, %v120_v15, %v113_v23  ;;  %v153_v27 = vperm.slane %v151_v25, 0  ;;  %v162_v28 = vld [vmem:[#allocation5 + $0x7] ss:$8 sm:$0x3]  ;;  %vm94_vm8 = vcmp.eq.s32.totalorder %v86_v17, 4294967293  ;;  %vm105_vm9 = vcmp.eq.s32.totalorder %v86_v17, 4294967294 }
  0x15   :  { %v135_v29 = vsel %vm126_vm3, %v131_v21, %v124_v26  ;;  %v164_v30 = vperm.slane %v162_v28, 0  ;;  %v173_v31 = vld [vmem:[#allocation5 + $0x10] ss:$8 sm:$0x3]  ;;  %v103_v32 = vsel %vm94_vm8, %v99_v14, %v90_v13  ;;  %vm116_vm10 = vcmp.eq.s32.totalorder %v86_v17, 4294967295 }
  0x16   :  { %v146_v33 = vsel %vm137_vm4, %v142_v24, %v135_v29  ;;  %v175_v34 = vperm.slane %v173_v31, 0  ;;  %v114_v35 = vsel %vm105_vm9, %v110_v18, %v103_v32  ;;  %vm127_vm11 = vcmp.eq.s32.totalorder %v86_v17, 0 }
  0x17   :  { %v157_v36 = vsel %vm148_vm5, %v153_v27, %v146_v33  ;;  %v125_v37 = vsel %vm116_vm10, %v121_v19, %v114_v35  ;;  %v132_v38 = vperm.slane %v129_v16, 1  ;;  %vm138_vm12 = vcmp.eq.s32.totalorder %v86_v17, 1 }
  0x18   :  { %v168_v39 = vsel %vm159_vm6, %v164_v30, %v157_v36  ;;  %v143_v40 = vperm.slane %v140_v22, 1  ;;  %vm149_vm13 = vcmp.eq.s32.totalorder %v86_v17, 2  ;;  %v154_v41 = vperm.slane %v151_v25, 1 }
  0x19   :  { %v179_v42 = vsel %vm170_vm7, %v175_v34, %v168_v39  ;;  %v136_v43 = vsel %vm127_vm11, %v132_v38, %v125_v37  ;;  %vm160_vm14 = vcmp.eq.s32.totalorder %v86_v17, 3  ;;  %v165_v44 = vperm.slane %v162_v28, 1 }
  0x1a   :  { %181 = vst [vmem:[#allocation7] sm:$0xff] %v179_v42  ;;  %v147_v45 = vsel %vm138_vm12, %v143_v40, %v136_v43  ;;  %vm171_vm15 = vcmp.ge.s32.totalorder %v86_v17, 4  ;;  %v176_v46 = vperm.slane %v173_v31, 1 }
  0x1b   :  { %v158_v47 = vsel %vm149_vm13, %v154_v41, %v147_v45 }
  0x1c   :  { %v169_v48 = vsel %vm160_vm14, %v165_v44, %v158_v47 }
  0x1d   :  { %v180_v49 = vsel %vm171_vm15, %v176_v46, %v169_v48 }
  0x1e   :  { %182 = vst [vmem:[#allocation7 + $0x8] sm:$0xff] %v180_v49 }
  0x1f   :  { %193 = dma.vmem_to_hbm [thread:$0]  %s189_s1, 256, %s191_s23, [#allocation4]  }
  0x20   :  { %282 = dma.done.wait [#allocation4], 256  }
  0x21   :  { %283 = vsyncadd [#allocation4], 4294967040 }
  0x22   :  { %198 = vsyncpa [#allocation3], 1 }
  0x23   :  { %199 = vsyncpa [#allocation6], 1 }
  0x24   :  { %200 = vsyncpa [#allocation4], 1 }

</bundles_post_ra>
